<compile_context>
chip_gen: v6e
topology: v6e:2x2x1
jax: 0.10.0
libtpu: 0.0.40
codegen_flags: <defaults>
</compile_context>

<pallas_src>
import jax
import jax.numpy as jnp
import numpy as np
from jax.experimental import pallas as pl
from jax.experimental.pallas import tpu as pltpu

_LANE = 128


def _add_noise_kernel(img_ref, noise_ref, out_ref):
    # img_ref / out_ref : (1, C, tile)            or (1, C, s_tile, 128)
    # noise_ref         : (1, 1, tile)            or (1, 1, s_tile, 128)
    # weight (static, ==1 in the module) is already folded into `noise`;
    # the single noise plane broadcasts over the channel axis.
    out_ref[...] = img_ref[...] + noise_ref[...]


def _round_up(x, m):
    return (x + m - 1) // m * m


def _vmem_capacity_bytes():
    try:
        cap = getattr(pltpu.get_tpu_info(), "vmem_capacity_bytes", None)
        if cap:
            return int(cap)
    except Exception:
        pass
    return 64 * 1024 * 1024  # conservative default = v7x per-TensorCore VMEM


def noise_injection(image, key, weight=1.0):
    """image: (B, C, H, W). Returns image + weight * noise, noise ~ N(0,1) per (B,1,H,W)."""
    B, C, H, W = image.shape
    HW = H * W
    dtype = image.dtype
    itemsize = jnp.dtype(dtype).itemsize
    sub = max(8, 32 // itemsize)        # sublane tile: 8 f32, 16 bf16, 32 int8
    weight = float(weight)              # must be static (plain attribute in the module)

    vmem_cap = _vmem_capacity_bytes()
    # budget for the double-buffered (input + output + noise) blocks
    block_budget = min(vmem_cap // 2, 36 * 1024 * 1024)

    # Noise plane, broadcast over C inside the kernel (matches image.new_empty(B,1,H,W).normal_()).
    noise = jax.random.normal(key, (B, 1, HW), dtype=dtype)
    if weight != 1.0:
        noise = noise * jnp.asarray(weight, dtype)
    img = image.reshape(B, C, HW)

    use_4d = (C < sub) and (HW % _LANE == 0)
    if use_4d:
        # Small C: put a chunk of HW on the sublane axis -> full (8,128) occupancy.
        S = HW // _LANE
        img = img.reshape(B, C, S, _LANE)
        noise = noise.reshape(B, 1, S, _LANE)
        bytes_per_row = 2 * (2 * C + 1) * _LANE * itemsize     # dbl-buffered in+out+noise
        if bytes_per_row * _round_up(S, sub) <= block_budget:
            s_tile = S                                          # full extent per batch
        else:
            s_tile = max(sub, (block_budget // bytes_per_row) // sub * sub)
        num_tiles = pl.cdiv(S, s_tile)
        if B * num_tiles < 2 and s_tile >= 2 * sub:             # keep both v7x TCs busy
            s_tile = _round_up(pl.cdiv(s_tile, 2), sub)
            num_tiles = pl.cdiv(S, s_tile)
        block, nblock = (1, C, s_tile, _LANE), (1, 1, s_tile, _LANE)
        idx = lambda b, t: (b, 0, t, 0)
        needed = 2 * (2 * C + 1) * _round_up(s_tile, sub) * _LANE * itemsize
    else:
        # General lane-dense layout: (B, C, HW) with C on the sublane axis.
        C_pad = _round_up(C, sub)
        bytes_per_lane = 2 * (2 * C_pad + sub) * itemsize       # dbl-buffered in+out+noise
        if HW < _LANE:
            tile = HW                                           # full (unaligned) extent
        else:
            hw_floor = (HW // _LANE) * _LANE
            budget_tile = max(_LANE, (block_budget // bytes_per_lane) // _LANE * _LANE)
            tile = min(hw_floor, budget_tile)
        num_tiles = pl.cdiv(HW, tile)                           # ragged last block is masked
        if B * num_tiles < 2 and tile > _LANE:
            tile = max(_LANE, _round_up(pl.cdiv(tile, 2), _LANE))
            num_tiles = pl.cdiv(HW, tile)
        block, nblock = (1, C, tile), (1, 1, tile)
        idx = lambda b, t: (b, 0, t)
        needed = bytes_per_lane * tile

    # Explicit VMEM limit with headroom; never budget up to the physical cap (v7x = 64 MiB).
    vmem_limit = int(min(0.8 * vmem_cap, max(needed + needed // 2, 8 * 1024 * 1024)))

    out = pl.pallas_call(
        _add_noise_kernel,
        out_shape=jax.ShapeDtypeStruct(img.shape, dtype),
        grid=(B, num_tiles),
        in_specs=[
            pl.BlockSpec(block, idx),    # image tile
            pl.BlockSpec(nblock, idx),   # noise plane tile (broadcast over C in-kernel)
        ],
        out_specs=pl.BlockSpec(block, idx),
        compiler_params=pltpu.CompilerParams(
            dimension_semantics=("parallel", "parallel"),
            vmem_limit_bytes=vmem_limit,
        ),
        cost_estimate=pl.CostEstimate(
            flops=B * C * HW,
            transcendentals=0,
            bytes_accessed=(2 * B * C * HW + B * HW) * itemsize,
        ),
    )(img, noise)

    return out.reshape(B, C, H, W)


if __name__ == "__main__":
    # --- primary shape (matches the module's typical small-C use) ---
    B, C, H, W = 2, 4, 16, 16
    img_key, noise_key = jax.random.split(jax.random.PRNGKey(0))
    image = jax.random.normal(img_key, (B, C, H, W), dtype=jnp.float32)

    out = jax.block_until_ready(noise_injection(image, noise_key))

    assert out.shape == image.shape and out.dtype == image.dtype
    # Exact reference: same key / shape / dtype as inside the wrapper.
    ref_noise = jax.random.normal(noise_key, (B, 1, H * W), dtype=image.dtype).reshape(B, 1, H, W)
    np.testing.assert_allclose(np.asarray(out), np.asarray(image + ref_noise), atol=1e-6)

    diff = np.asarray(out - image)               # injected noise as seen by each channel
    for ch in range(1, C):                       # same noise plane across channels
        np.testing.assert_allclose(diff[:, ch], diff[:, 0], atol=1e-5)
    assert not np.allclose(diff[0, 0], diff[1, 0])          # independent per batch
    assert abs(float(diff[:, 0].mean())) < 0.5 and 0.5 < float(diff[:, 0].std()) < 1.5

    # --- secondary shape: larger C, non-lane-aligned H*W (exercises the ragged 3D path) ---
    B2, C2, H2, W2 = 1, 16, 24, 20
    k_img2, k_noise2 = jax.random.split(jax.random.PRNGKey(1))
    image2 = jax.random.normal(k_img2, (B2, C2, H2, W2), dtype=jnp.float32)
    out2 = jax.block_until_ready(noise_injection(image2, k_noise2))
    ref2 = image2 + jax.random.normal(k_noise2, (B2, 1, H2 * W2),
                                      dtype=image2.dtype).reshape(B2, 1, H2, W2)
    np.testing.assert_allclose(np.asarray(out2), np.asarray(ref2), atol=1e-6)

    print("KERNEL_OK")
</pallas_src>

<mosaic_0001>
module attributes {stable_mosaic.version = 11 : i64} {
  func.func @_add_noise_kernel(%arg0: i32, %arg1: i32, %arg2: memref<1x4x2x128xf32, #tpu.memory_space<vmem>>, %arg3: memref<1x1x2x128xf32, #tpu.memory_space<vmem>>, %arg4: memref<1x4x2x128xf32, #tpu.memory_space<vmem>>) attributes {dimension_semantics = [#tpu.dimension_semantics<parallel>, #tpu.dimension_semantics<parallel>], iteration_bounds = array<i64: 2, 1>, scalar_prefetch = 0 : i64, scratch_operands = 0 : i64, tpu.core_type = #tpu.core_type<tc>, window_params = [{transform_indices = @transform_0, window_bounds = array<i64: 1, 4, 2, 128>}, {transform_indices = @transform_1, window_bounds = array<i64: 1, 1, 2, 128>}, {transform_indices = @transform_2, window_bounds = array<i64: 1, 4, 2, 128>}]} {
    %c0 = arith.constant 0 : index
    %c0_0 = arith.constant 0 : index
    %c0_1 = arith.constant 0 : index
    %c0_2 = arith.constant 0 : index
    %0 = vector.load %arg2[%c0, %c0_0, %c0_1, %c0_2] : memref<1x4x2x128xf32, #tpu.memory_space<vmem>>, vector<1x4x2x128xf32>
    %c0_3 = arith.constant 0 : index
    %c0_4 = arith.constant 0 : index
    %c0_5 = arith.constant 0 : index
    %c0_6 = arith.constant 0 : index
    %1 = vector.load %arg3[%c0_3, %c0_4, %c0_5, %c0_6] : memref<1x1x2x128xf32, #tpu.memory_space<vmem>>, vector<1x1x2x128xf32>
    %2 = vector.broadcast %1 : vector<1x1x2x128xf32> to vector<1x4x2x128xf32>
    %3 = arith.addf %0, %2 : vector<1x4x2x128xf32>
    %c0_7 = arith.constant 0 : index
    %c0_8 = arith.constant 0 : index
    %c0_9 = arith.constant 0 : index
    %c0_10 = arith.constant 0 : index
    %4 = vector.load %arg4[%c0_7, %c0_8, %c0_9, %c0_10] : memref<1x4x2x128xf32, #tpu.memory_space<vmem>>, vector<1x4x2x128xf32>
    tpu.vector_store %arg4[%c0_7, %c0_8, %c0_9, %c0_10], %3 {strides = array<i32>} : memref<1x4x2x128xf32, #tpu.memory_space<vmem>>, vector<1x4x2x128xf32>,
    return
  }
  func.func @transform_0(%arg0: i32, %arg1: i32) -> (i32, i32, i32, i32) {
    %c0_i32 = arith.constant 0 : i32
    %c0_i32_0 = arith.constant 0 : i32
    %c0_i32_1 = arith.constant 0 : i32
    return %arg0, %c0_i32, %arg1, %c0_i32_0 : i32, i32, i32, i32
  }
  func.func @transform_1(%arg0: i32, %arg1: i32) -> (i32, i32, i32, i32) {
    %c0_i32 = arith.constant 0 : i32
    %c0_i32_0 = arith.constant 0 : i32
    %c0_i32_1 = arith.constant 0 : i32
    return %arg0, %c0_i32, %arg1, %c0_i32_0 : i32, i32, i32, i32
  }
  func.func @transform_2(%arg0: i32, %arg1: i32) -> (i32, i32, i32, i32) {
    %c0_i32 = arith.constant 0 : i32
    %c0_i32_0 = arith.constant 0 : i32
    %c0_i32_1 = arith.constant 0 : i32
    return %arg0, %c0_i32, %arg1, %c0_i32_0 : i32, i32, i32, i32
  }
}

</mosaic_0001>

<bundles_post_ra>
// kernel: tpu_custom_call.1
= control target key start
LH: loop header
LB: loop body
LE: loop exit
PB: predicated region body
PF: predicated region fallthrough
CT: control target
= control target key end

     0   :  { %7 = vsyncpa [#allocation3], 0  ;;  %s787_s0 = inlined_call_operand.hbm [shape: f32[2,4,2,128], index: 0, kind: input, shape index: {}]   ;;  %s788_s1 = inlined_call_operand.hbm [shape: f32[2,1,2,128], index: 1, kind: input, shape index: {}]   ;;  %s789_s2 = inlined_call_operand.hbm [shape: f32[2,4,2,128], index: 2, kind: output, shape index: {}]  }
   0x1   :  { %9 = vsyncpa [#allocation3 + $0x1], 0 }
   0x2   :  { %10 = vsyncpa [#allocation6], 0 }
   0x3   :  { %12 = vsyncpa [#allocation6 + $0x1], 0 }
   0x4   :  { %13 = vsyncpa [#allocation4], 0 }
   0x5   :  { %15 = vsyncpa [#allocation4 + $0x1], 0  ;;  %s611_s9 = smov 0   ;;  %s613_s10 = smov 0  }
   0x6   :  { %s615_s11 = smov 0   ;;  %s617_s12 = smov 0  }
   0x7   :  { %s619_s13 = smov 0   ;;  %s621_s14 = smov 0  }
   0x8 LB: > { %s356_s15 = sadd.s32 4294967295, %s587_s14   ;;  %s357_s16 = sadd.s32 4294967294, %s587_s14   ;;  %s587_s14 = sphi %s621_s14, %s21_s14   ;;  %s583_s13 = sphi %s619_s13, %s800_s13   ;;  %s579_s12 = sphi %s617_s12, %s799_s12   ;;  %s575_s11 = sphi %s615_s11, %s798_s11   ;;  %s571_s10 = sphi %s613_s10, %s797_s10   ;;  %s567_s9 = sphi %s611_s9, %s796_s9  }
   0x9   : > { %s33_s17 = sadd.s32 1, %s583_s13  ;;  %s42_s18 = sadd.s32 1, %s575_s11 }
   0xa   : > { %p35_p0 = scmp.ge.s32.totalorder %s33_s17, 2  ;;  %p49_p1 = scmp.ne.s32.totalorder %s575_s11, %s571_s10 }
   0xb   : > { %p50_p2 = scmp.eq.s32.totalorder %s587_s14, 0  ;;  %p55_p3 = scmp.ne.s32.totalorder %s571_s10, %s567_s9 }
   0xc   : > { %s802_s17 = smov (%p35_p0, %s33_s17), 0  ;;  %p56_p5 = scmp.eq.s32.totalorder %s356_s15, 0 }
   0xd   : > { %p652_p4 = por %p50_p2, %p49_p1  ;;  %s37_s20 = ssub.s32 %s583_s13, %s802_s17 }
   0xe   : > { %p109_p6 = scmp.eq.s32.totalorder %s356_s15, 1  ;;  %p40_p7 = scmp.eq.s32.totalorder %s37_s20, 0 }
   0xf   : > { %p658_p8 = por %p56_p5, %p55_p3  ;;  %p115_p10 = scmp.eq.s32.totalorder %s357_s16, 1 }
  0x10   : > { %p662_p9 = por %p109_p6, %p49_p1  ;;  %p359_p12 = scmp.ge.s32.totalorder %s587_s14, 2 }
  0x11   : > { %s667_s23 = scalar_select %p40_p7, %s575_s11, %s42_s18  }
  0x12   : > { %p669_p11 = por %p115_p10, %p55_p3  ;;  %p393_p13 = scmp.lt.s32.totalorder %s587_s14, 2 }
  0x13   : > { %s676_s25 = sand.u32 1, %s575_s11   ;;  %s374_s27 = sshll.u32 %s583_s13, 7 }
  0x14   : > { %s360_s26 = sshll.u32 %s676_s25, 3  ;;  %s146_s30 = scalar_lea.hbm %s787_s0, %s374_s27 }
  0x15   : > { %s139_s3 = scalar_lea.vmem [#allocation2], %s360_s26  ;;  %p685_p0 = pnand %p393_p13, %p652_p4 }
  0x16   : > { %s147_s4 = sshll.u32 %s139_s3, 4  ;;  %p365_p1 = scmp.ge.s32.totalorder %s587_s14, 1  ;;  %s148_s4 = int_to_ptr.vmem [resolvable:$true] %s147_s4 }
  0x17   : > { %s136_s6 = scalar_lea.sflag [#allocation3], %s676_s25  ;;  %p449_p2 = pneg %p685_p0 }
  0x18   : > { %s460_s7 = scalar_lea.vmem %s148_s4, 128  ;;  %s589_s8 = smov [#allocation2]  }
  0x19   : > { %p461_p3 = scmp.ne.s32.totalorder %s148_s4, %s460_s7  ;;  %s465_s15 = sshll.u32 %s589_s8, 4  ;;  %s466_s15 = int_to_ptr.vmem [resolvable:$false] %s465_s15 }
  0x1a   : > { %s467_s16 = scalar_lea.vmem %s466_s15, 256  ;;  %p468_p4 = scmp.lt.s32.totalorder %s148_s4, %s466_s15 }
  0x1b   : > { %p463_p5 = pnand %p461_p3, %p449_p2  ;;  %p469_p7 = scmp.lt.s32.totalorder %s467_s16, %s460_s7 }
  0x1d   : > { %p464_p6 = pneg %p463_p5  ;;  %p470_p10 = por %p469_p7, %p468_p4 }
  0x1f   : > { %p471_p13 = pnand %p470_p10, %p464_p6 }
  0x21   : > { %474 = shalt.err (!%p471_p13)
}
  0x22   : > { %s590_s18 = smov 32   ;;  %s591_s19 = smov 2  }
  0x23   : > { %385 = dma.hbm_to_vmem [thread:$0]  (!%p685_p0), %s146_s30, 128, %s148_s4, %s136_s6, %s590_s18, %s590_s18, %s591_s19  }
  0x24   : > { %p174_p3 = scmp.lt.s32.totalorder %s587_s14, 3  ;;  %s363_s20 = sshll.u32 %s676_s25, 1 }
  0x25   : > { %s364_s26 = sshll.u32 %s583_s13, 5  ;;  %s161_s7 = scalar_lea.vmem [#allocation5], %s363_s20 }
  0x26   : > { %p703_p5 = pnand %p365_p1, %p174_p3  ;;  %s167_s3 = scalar_lea.hbm %s788_s1, %s364_s26 }
  0x27   : > { %s169_s8 = sshll.u32 %s161_s7, 4  ;;  %s158_s15 = scalar_lea.sflag [#allocation6], %s676_s25  ;;  %s170_s8 = int_to_ptr.vmem [resolvable:$true] %s169_s8 }
  0x28   : > { %s488_s16 = scalar_lea.vmem %s170_s8, 32  ;;  %s592_s30 = smov [#allocation5]  }
  0x29   : > { %p489_p6 = scmp.ne.s32.totalorder %s170_s8, %s488_s16  ;;  %s493_s4 = sshll.u32 %s592_s30, 4  ;;  %s494_s4 = int_to_ptr.vmem [resolvable:$false] %s493_s4 }
  0x2a   : > { %s495_s6 = scalar_lea.vmem %s494_s4, 64  ;;  %p496_p1 = scmp.lt.s32.totalorder %s170_s8, %s494_s4 }
  0x2b   : > { %p491_p4 = pnand %p489_p6, %p449_p2  ;;  %p497_p10 = scmp.lt.s32.totalorder %s495_s6, %s488_s16 }
  0x2d   : > { %p492_p7 = pneg %p491_p4  ;;  %p498_p13 = por %p497_p10, %p496_p1 }
  0x2f   : > { %p499_p3 = pnand %p498_p13, %p492_p7 }
  0x31   : > { %502 = shalt.err (!%p499_p3)
}
  0x32   : > { %388 = dma.hbm_to_vmem [thread:$0]  (!%p685_p0), %s167_s3, 32, %s170_s8, %s158_s15  }
  0x33   : > { %178 = sbr.rel (%p703_p5) target bundleno = 85 (0x55), region = 28  ;;  %s719_s25 = sand.u32 (!%p703_p5), 1, %s571_s10  }
  0x34   : > { %s366_s18 = sshll.u32 (!%p703_p5), %s719_s25, 3  ;;  %s181_s19 = scalar_lea.sflag (!%p703_p5), [#allocation3], %s719_s25 }
  0x35   : > { %s184_s20 = scalar_lea.vmem (!%p703_p5), [#allocation2], %s366_s18 }
  0x38   : > { %554 = dma.done.wait (%p658_p8), %s181_s19, 128  }
  0x39   : > { %556 = vsyncadd (%p658_p8), %s181_s19, 4294967168  ;;  %s367_s5 = sshll.u32 %s719_s25, 1  ;;  %s190_s26 = scalar_lea.sflag [#allocation6], %s719_s25 }
  0x3a   : > { %s193_s27 = scalar_lea.vmem [#allocation5], %s367_s5 }
  0x3b   : > { %558 = dma.done.wait (%p658_p8), %s190_s26, 32  }
  0x3c   : > { %560 = vsyncadd (%p658_p8), %s190_s26, 4294967264  ;;  %s218_s28 = scalar_lea.vmem [#allocation7], %s366_s18  ;;  %s375_s3 = sshll.u32 %s579_s12, 7  ;;  %v219_v0 = vld [vmem:[%s184_s20] sm:$0x3] }
  0x3d   : > { %s247_s29 = sshll.u32 %s218_s28, 4  ;;  %v223_v1 = vld [vmem:[%s193_s27] sm:$0x3]  ;;  %v220_v2 = vld [vmem:[%s184_s20 + $0x2] sm:$0x3]  ;;  %s739_s8 = scalar_lea.hbm %s789_s2, %s375_s3  ;;  %s734_s29 = int_to_ptr.vmem [resolvable:$true] %s247_s29 }
  0x3e   : > { %v224_v3 = vadd.f32 %v223_v1, %v219_v0  ;;  %v225_v4 = vadd.f32 %v223_v1, %v220_v2  ;;  %v221_v5 = vld [vmem:[%s184_s20 + $0x4] sm:$0x3]  ;;  %v222_v6 = vld [vmem:[%s184_s20 + $0x6] sm:$0x3]  ;;  %s233_s12 = scalar_lea.sflag [#allocation4], %s719_s25  ;;  %s503_s15 = scalar_lea.vmem %s734_s29, 128 }
  0x3f   : > { %v226_v7 = vadd.f32 %v223_v1, %v221_v5  ;;  %v227_v8 = vadd.f32 %v223_v1, %v222_v6  ;;  %p504_p8 = scmp.ne.s32.totalorder %s734_s29, %s503_s15  ;;  %s593_s16 = smov [#allocation7]  }
  0x40   : > { %228 = vst [vmem:[%s218_s28] sm:$0x3] %v224_v3  ;;  %229 = vst [vmem:[%s218_s28 + $0x2] sm:$0x3] %v225_v4  ;;  %s507_s30 = sshll.u32 %s593_s16, 4  ;;  %s508_s30 = int_to_ptr.vmem [resolvable:$false] %s507_s30 }
  0x41   : > { %230 = vst [vmem:[%s218_s28 + $0x4] sm:$0x3] %v226_v7  ;;  %231 = vst [vmem:[%s218_s28 + $0x6] sm:$0x3] %v227_v8  ;;  %p505_p0 = pnand %p504_p8, %p662_p9  ;;  %s509_s4 = scalar_lea.vmem %s508_s30, 256 }
  0x42   : > { %p510_p5 = scmp.lt.s32.totalorder %s734_s29, %s508_s30  ;;  %p511_p6 = scmp.lt.s32.totalorder %s509_s4, %s503_s15 }
  0x43   : > { %p506_p2 = pneg %p505_p0 }
  0x44   : > { %p512_p4 = por %p511_p6, %p510_p5 }
  0x46   : > { %p513_p7 = pnand %p512_p4, %p506_p2 }
  0x48   : > { %516 = shalt.err (!%p513_p7)
}
  0x49   : > { %s517_s6 = scalar_lea.hbm %s739_s8, 128  ;;  %s521_s20 = scalar_lea.hbm %s789_s2, 256 }
  0x4a   : > { %p518_p1 = scmp.ne.s32.totalorder %s739_s8, %s517_s6  ;;  %p522_p3 = scmp.lt.s32.totalorder %s739_s8, %s789_s2 }
  0x4b   : > { %p523_p8 = scmp.lt.s32.totalorder %s521_s20, %s517_s6 }
  0x4c   : > { %p519_p10 = pnand %p518_p1, %p662_p9 }
  0x4d   : > { %p524_p0 = por %p523_p8, %p522_p3 }
  0x4e   : > { %p520_p13 = pneg %p519_p10 }
  0x50   : > { %p525_p2 = pnand %p524_p0, %p520_p13 }
  0x52   : > { %528 = shalt.err (!%p525_p2)
}
  0x53   : > { %s594_s27 = smov 32   ;;  %s595_s28 = smov 2  }
  0x54   : > { %380 = dma.vmem_to_hbm [thread:$0]  (%p662_p9), %s734_s29, 128, %s739_s8, %s233_s12, %s594_s27, %s594_s27, %s595_s28  }
  0x55 PF: > { %s262_s3 = sand.u32 1, %s567_s9   ;;  %p390_p5 = pnand %p359_p12, %p669_p11 }
  0x56   : > { %s263_s7 = scalar_lea.sflag [#allocation4], %s262_s3 }
  0x57   : > { %p391_p6 = pneg %p390_p5 }
  0x59   : > { %562 = dma.done.wait (%p391_p6), %s263_s7, 128  }
  0x5a   : > { %564 = vsyncadd (%p391_p6), %s263_s7, 4294967168  ;;  %s21_s14 = sadd.s32 1, %s587_s14   ;;  %s796_s9 = smov %s571_s10 }
  0x5b   : > { %p18_p4 = scmp.ge.s32.totalorder %s21_s14, 4   ;;  %s797_s10 = smov %s575_s11 }
  0x5c   : > { %s798_s11 = smov %s667_s23  ;;  %s799_s12 = smov %s583_s13 }
  0x5d   : > { %s800_s13 = smov %s802_s17  ;;  %20 = sbr.rel (!%p18_p4) target bundleno = 8 (0x8), region = 86 }
  0x62   :  { %268 = vsyncpa [#allocation3], 1 }
  0x63   :  { %270 = vsyncpa [#allocation3 + $0x1], 1 }
  0x64   :  { %271 = vsyncpa [#allocation6], 1 }
  0x65   :  { %273 = vsyncpa [#allocation6 + $0x1], 1 }
  0x66   :  { %274 = vsyncpa [#allocation4], 1 }
  0x67   :  { %276 = vsyncpa [#allocation4 + $0x1], 1 }

</bundles_post_ra>
